<compile_context>
chip_gen: v6e
topology: v6e:2x2x1
jax: 0.10.0
libtpu: 0.0.40
codegen_flags: <defaults>
</compile_context>

<pallas_src>
import jax
import jax.numpy as jnp
from jax.experimental import pallas as pl
from jax.experimental.pallas import tpu as pltpu

IN_FEATURES = 100
OUT_FEATURES = 20
DROP_P = 0.5
SCALE = 1.0 / (1.0 - DROP_P)
# keep an element iff hash_u32 < KEEP_THRESHOLD  (P[keep] = 1 - p, exact here:
# (1-0.5)*2^32 = 2^31).  If DROP_P changes this formula stays correct.
KEEP_THRESHOLD = int(round((1.0 - DROP_P) * 4294967296.0))
MAX_TILE_B = 1024  # rows per grid step; x block = 1024*100*4B = 400 KiB,
                   # double-buffered ~0.8 MiB -> safe on v5e/v6e/v7x VMEM.


def _hash_u32(idx_u32, seed_u32):
    """Counter-based PRNG: murmur3 fmix32 of (global element index ^ seed)."""
    h = idx_u32 ^ seed_u32
    h = h ^ (h >> 16)
    h = h * jnp.uint32(0x85EBCA6B)
    h = h ^ (h >> 13)
    h = h * jnp.uint32(0xC2B2AE35)
    h = h ^ (h >> 16)
    return h


def dropout2_kernel(seed_ref, x_ref, wt_ref, b_ref, o_ref):
    # ---- Linear: y = x @ W^T + b.  W was pre-transposed to (100, 20) in the
    # wrapper, so the MXU consumes it directly (no in-kernel transpose). ----
    y = jnp.dot(x_ref[...], wt_ref[...], preferred_element_type=jnp.float32)
    y = y + b_ref[...]  # (1, 20) broadcasts over the rows of the tile

    # ---- Dropout (training mode, p = 0.5, inverted scaling) ----
    # Counter = global flat output index, so every grid step (batch tile) gets
    # an independent mask and the mask is reproducible from `seed` alone.
    tile_b = x_ref.shape[0]
    row = jax.lax.broadcasted_iota(jnp.int32, (tile_b, OUT_FEATURES), 0)
    col = jax.lax.broadcasted_iota(jnp.int32, (tile_b, OUT_FEATURES), 1)
    gidx = (pl.program_id(0) * tile_b + row) * OUT_FEATURES + col
    h = _hash_u32(gidx.astype(jnp.uint32), seed_ref[0].astype(jnp.uint32))
    keep = h < jnp.uint32(KEEP_THRESHOLD)

    o_ref[...] = jnp.where(keep, y * jnp.float32(SCALE),
                           jnp.float32(0.0)).astype(o_ref.dtype)


def dropout2_forward(x, w, b, seed, *, max_tile_b=MAX_TILE_B):
    """Training-mode forward of nn.Linear(100, 20) + nn.Dropout(p=0.5).

    x: (B, 100) f32, w: (20, 100) f32 (PyTorch layout), b: (20,) f32,
    seed: int scalar controlling the dropout mask.  Returns (B, 20) f32.
    """
    batch = x.shape[0]
    w_t = jnp.transpose(w)                    # (100, 20), one tiny relayout
    b2d = b.reshape(1, OUT_FEATURES)          # lane-friendly 2D bias
    seed_arr = jnp.asarray([seed], dtype=jnp.int32)

    # Batch tile: whole array when small (block == full dim is always legal),
    # otherwise 1024-row tiles (multiple of 8) pipelined by BlockSpec.
    tile_b = batch if batch <= max_tile_b else max_tile_b
    grid = (pl.cdiv(batch, tile_b),)

    grid_spec = pltpu.PrefetchScalarGridSpec(
        num_scalar_prefetch=1,                # seed -> SMEM
        grid=grid,
        in_specs=[
            pl.BlockSpec((tile_b, IN_FEATURES), lambda i, seed: (i, 0)),        # x
            pl.BlockSpec((IN_FEATURES, OUT_FEATURES), lambda i, seed: (0, 0)),  # W^T (resident)
            pl.BlockSpec((1, OUT_FEATURES), lambda i, seed: (0, 0)),            # bias (resident)
        ],
        out_specs=pl.BlockSpec((tile_b, OUT_FEATURES), lambda i, seed: (i, 0)),
    )

    return pl.pallas_call(
        dropout2_kernel,
        out_shape=jax.ShapeDtypeStruct((batch, OUT_FEATURES), jnp.float32),
        grid_spec=grid_spec,
        compiler_params=pltpu.CompilerParams(
            dimension_semantics=("parallel",),  # batch tiles independent -> megacore on v7x
        ),
    )(seed_arr, x, w_t, b2d)


if __name__ == "__main__":
    key = jax.random.PRNGKey(0)
    kx, kw, kb = jax.random.split(key, 3)

    batch = 8
    # nn.Linear default init: U(-1/sqrt(fan_in), 1/sqrt(fan_in)).
    bound = 1.0 / (IN_FEATURES ** 0.5)
    w = jax.random.uniform(kw, (OUT_FEATURES, IN_FEATURES), jnp.float32, -bound, bound)
    b = jax.random.uniform(kb, (OUT_FEATURES,), jnp.float32, -bound, bound)
    x = jax.random.normal(kx, (batch, IN_FEATURES), jnp.float32)

    out = dropout2_forward(x, w, b, seed=1234)
    out = jax.block_until_ready(out)

    # Sanity: shape, surviving elements equal 2 * (x @ W.T + b), mask non-trivial.
    assert out.shape == (batch, OUT_FEATURES)
    ref = x @ w.T + b
    nz = out != 0.0
    assert jnp.allclose(out[nz], SCALE * ref[nz], atol=1e-4, rtol=1e-4)
    kept = int(jnp.sum(nz))
    assert 0 < kept < batch * OUT_FEATURES

    print("KERNEL_OK")
</pallas_src>

<mosaic_0001>
module attributes {stable_mosaic.version = 11 : i64} {
  func.func @dropout2_kernel(%arg0: i32, %arg1: memref<1xi32, #tpu.memory_space<smem>>, %arg2: memref<8x100xf32, #tpu.memory_space<vmem>>, %arg3: memref<100x20xf32, #tpu.memory_space<vmem>>, %arg4: memref<1x20xf32, #tpu.memory_space<vmem>>, %arg5: memref<8x20xf32, #tpu.memory_space<vmem>>) attributes {dimension_semantics = [#tpu.dimension_semantics<parallel>], iteration_bounds = array<i64: 1>, scalar_prefetch = 1 : i64, scratch_operands = 0 : i64, tpu.core_type = #tpu.core_type<tc>, window_params = [{transform_indices = @transform_0, window_bounds = array<i64: 8, 100>}, {pipeline_mode = #tpu.pipeline_mode<synchronous>, transform_indices = @transform_1, window_bounds = array<i64: 100, 20>}, {pipeline_mode = #tpu.pipeline_mode<synchronous>, transform_indices = @transform_2, window_bounds = array<i64: 1, 20>}, {transform_indices = @transform_3, window_bounds = array<i64: 8, 20>}]} {
    %c0 = arith.constant 0 : index
    %c0_0 = arith.constant 0 : index
    %0 = vector.load %arg2[%c0, %c0_0] : memref<8x100xf32, #tpu.memory_space<vmem>>, vector<8x100xf32>
    %c0_1 = arith.constant 0 : index
    %c0_2 = arith.constant 0 : index
    %1 = vector.load %arg3[%c0_1, %c0_2] : memref<100x20xf32, #tpu.memory_space<vmem>>, vector<100x20xf32>
    %cst = arith.constant dense<0.000000e+00> : vector<8x20xf32>
    %2 = tpu.matmul %0, %1, %cst {dimension_numbers = #tpu.dot_dimension_numbers<[1], [0], [0], [1], [0, 0, 1, 1], [], []>} : vector<8x100xf32>, vector<100x20xf32>, vector<8x20xf32> -> vector<8x20xf32>
    %c0_3 = arith.constant 0 : index
    %c0_4 = arith.constant 0 : index
    %3 = vector.load %arg4[%c0_3, %c0_4] : memref<1x20xf32, #tpu.memory_space<vmem>>, vector<1x20xf32>
    %4 = vector.broadcast %3 : vector<1x20xf32> to vector<8x20xf32>
    %5 = arith.addf %2, %4 : vector<8x20xf32>
    %6 = tpu.iota {dimensions = array<i32: 0>} : vector<8x20xi32>
    %7 = tpu.iota {dimensions = array<i32: 1>} : vector<8x20xi32>
    %c8_i32 = arith.constant 8 : i32
    %8 = arith.muli %arg0, %c8_i32 : i32
    %9 = vector.broadcast %8 : i32 to vector<8x20xi32>
    %10 = arith.addi %9, %6 : vector<8x20xi32>
    %c20_i32 = arith.constant 20 : i32
    %11 = vector.broadcast %c20_i32 : i32 to vector<8x20xi32>
    %12 = arith.muli %10, %11 : vector<8x20xi32>
    %13 = arith.addi %12, %7 : vector<8x20xi32>
    %c0_5 = arith.constant 0 : index
    %14 = memref.load %arg1[%c0_5] : memref<1xi32, #tpu.memory_space<smem>>
    %15 = vector.broadcast %14 : i32 to vector<8x20xi32>
    %16 = arith.xori %13, %15 : vector<8x20xi32>
    %c16_i32 = arith.constant 16 : i32
    %17 = vector.broadcast %c16_i32 : i32 to vector<8x20xi32>
    %18 = arith.shrui %16, %17 : vector<8x20xi32>
    %19 = arith.xori %16, %18 : vector<8x20xi32>
    %c-2048144789_i32 = arith.constant -2048144789 : i32
    %20 = vector.broadcast %c-2048144789_i32 : i32 to vector<8x20xi32>
    %21 = arith.muli %19, %20 : vector<8x20xi32>
    %c13_i32 = arith.constant 13 : i32
    %22 = vector.broadcast %c13_i32 : i32 to vector<8x20xi32>
    %23 = arith.shrui %21, %22 : vector<8x20xi32>
    %24 = arith.xori %21, %23 : vector<8x20xi32>
    %c-1028477387_i32 = arith.constant -1028477387 : i32
    %25 = vector.broadcast %c-1028477387_i32 : i32 to vector<8x20xi32>
    %26 = arith.muli %24, %25 : vector<8x20xi32>
    %c16_i32_6 = arith.constant 16 : i32
    %27 = vector.broadcast %c16_i32_6 : i32 to vector<8x20xi32>
    %28 = arith.shrui %26, %27 : vector<8x20xi32>
    %29 = arith.xori %26, %28 : vector<8x20xi32>
    %c-2147483648_i32 = arith.constant -2147483648 : i32
    %30 = vector.broadcast %c-2147483648_i32 : i32 to vector<8x20xi32>
    %31 = arith.cmpi ult, %29, %30 : vector<8x20xi32>
    %cst_7 = arith.constant 2.000000e+00 : f32
    %32 = vector.broadcast %cst_7 : f32 to vector<8x20xf32>
    %33 = arith.mulf %5, %32 : vector<8x20xf32>
    %cst_8 = arith.constant 0.000000e+00 : f32
    %34 = vector.broadcast %cst_8 : f32 to vector<8x20xf32>
    %35 = arith.select %31, %33, %34 : vector<8x20xi1>, vector<8x20xf32>
    %c0_9 = arith.constant 0 : index
    %c0_10 = arith.constant 0 : index
    %36 = vector.load %arg5[%c0_9, %c0_10] : memref<8x20xf32, #tpu.memory_space<vmem>>, vector<8x20xf32>
    tpu.vector_store %arg5[%c0_9, %c0_10], %35 {strides = array<i32>} : memref<8x20xf32, #tpu.memory_space<vmem>>, vector<8x20xf32>,
    return
  }
  func.func @transform_0(%arg0: i32, %arg1: memref<1xi32, #tpu.memory_space<smem>>) -> (i32, i32) {
    %c0_i32 = arith.constant 0 : i32
    %c0_i32_0 = arith.constant 0 : i32
    return %arg0, %c0_i32 : i32, i32
  }
  func.func @transform_1(%arg0: i32, %arg1: memref<1xi32, #tpu.memory_space<smem>>) -> (i32, i32) {
    %c0_i32 = arith.constant 0 : i32
    %c0_i32_0 = arith.constant 0 : i32
    %c0_i32_1 = arith.constant 0 : i32
    return %c0_i32, %c0_i32_0 : i32, i32
  }
  func.func @transform_2(%arg0: i32, %arg1: memref<1xi32, #tpu.memory_space<smem>>) -> (i32, i32) {
    %c0_i32 = arith.constant 0 : i32
    %c0_i32_0 = arith.constant 0 : i32
    %c0_i32_1 = arith.constant 0 : i32
    return %c0_i32, %c0_i32_0 : i32, i32
  }
  func.func @transform_3(%arg0: i32, %arg1: memref<1xi32, #tpu.memory_space<smem>>) -> (i32, i32) {
    %c0_i32 = arith.constant 0 : i32
    %c0_i32_0 = arith.constant 0 : i32
    return %arg0, %c0_i32 : i32, i32
  }
}

</mosaic_0001>

<bundles_post_ra>
// kernel: tpu_custom_call.1
= control target key start
LH: loop header
LB: loop body
LE: loop exit
PB: predicated region body
PF: predicated region fallthrough
CT: control target
= control target key end

     0   :  { %vm42_vm0 = vcmask 1043456   ;;  %v226_v1 = vmov 0.0   ;;  %vm227_vm1 = vmmov 0   ;;  %s305_s0 = inlined_call_operand.<no memory space> [shape: s32[1], index: 0, kind: input, shape index: {}]   ;;  %s306_s1 = inlined_call_operand.vmem [shape: f32[8,100], index: 1, kind: input, shape index: {}]   ;;  %s307_s2 = inlined_call_operand.vmem [shape: f32[100,20], index: 2, kind: input, shape index: {}]   ;;  %s308_s3 = inlined_call_operand.vmem [shape: f32[1,20], index: 3, kind: input, shape index: {}]   ;;  %s309_s4 = inlined_call_operand.hbm [shape: f32[8,20], index: 4, kind: output, shape index: {}]  }
   0x1   :  { %v30_v0 = vld [vmem:[%s307_s2 + $0x60] sm:$0xf]  ;;  %172 = vmatprep.subr.mxu0 %v226_v1  ;;  %v29_v2 = vld [vmem:[%s307_s2 + $0x58] sm:$0xff]  ;;  %198 = vmatprep.mubr.msk.f32.mxu0 %vm227_vm1, %v226_v1  ;;  %v28_v3 = vld [vmem:[%s307_s2 + $0x50] sm:$0xff] }
   0x2   :  { %173 = vmatpush3.msk.msra.mxu0 %vm42_vm0, %v30_v0  ;;  %v27_v4 = vld [vmem:[%s307_s2 + $0x48] sm:$0xff] }
   0x3   :  { %174 = vmatprep.subr.mxu0 %v226_v1 }
   0x4   :  { %175 = vmatpush3.msra.mxu0 %v29_v2 }
   0x5   :  { %176 = vmatprep.subr.mxu0 %v226_v1 }
   0x6   :  { %10 = vsyncpa [#allocation5], 0  ;;  %177 = vmatpush3.msra.mxu0 %v28_v3  ;;  %v26_v5 = vld [vmem:[%s307_s2 + $0x40] sm:$0xff]  ;;  %v25_v6 = vld [vmem:[%s307_s2 + $0x38] sm:$0xff]  ;;  %vm38_vm2 = vcmask 818176   ;;  %v116_v15 = vlaneseq  ;;  %v126_v20 = vstv %s305_s0  ;;  %s228_s19 = smov [#allocation4]  }
   0x7   :  { %178 = vmatprep.subr.mxu0 %v226_v1  ;;  %v24_v7 = vld [vmem:[%s307_s2 + $0x30] sm:$0xff]  ;;  %v23_v8 = vld [vmem:[%s307_s2 + $0x28] sm:$0xff]  ;;  %v22_v9 = vld [vmem:[%s307_s2 + $0x20] sm:$0xff]  ;;  %s147_s20 = sshll.u32 %s228_s19, 4  ;;  %vm139_vm4 = vcmask 162816   ;;  %s148_s20 = int_to_ptr.vmem [resolvable:$true] %s147_s20 }
   0x8   :  { %179 = vmatpush3.msra.mxu0 %v27_v4  ;;  %v21_v10 = vld [vmem:[%s307_s2 + $0x18] sm:$0xff]  ;;  %v20_v11 = vld [vmem:[%s307_s2 + $0x10] sm:$0xff]  ;;  %v19_v12 = vld [vmem:[%s307_s2 + $0x8] sm:$0xff]  ;;  %v117_v16 = vshrl.u32 %v116_v15, 7  ;;  %v119_v17 = vand.u32 127, %v116_v15  ;;  %s204_s0 = scalar_lea.vmem %s148_s20, 128  ;;  %p209_p1 = scmp.lt.s32.totalorder %s148_s20, %s148_s20 }
   0x9   :  { %180 = vmatprep.subr.mxu0 %v226_v1  ;;  %v18_v13 = vld [vmem:[%s307_s2] sm:$0xff]  ;;  %p205_p0 = scmp.ne.s32.totalorder %s148_s20, %s204_s0  ;;  %p210_p2 = scmp.lt.s32.totalorder %s204_s0, %s204_s0 }
   0xa   :  { %181 = vmatpush3.msra.mxu0 %v26_v5  ;;  %v17_v14 = vld [vmem:[%s306_s1] sm:$0xff]  ;;  %v123_v18 = vmul.u32 20, %v117_v16 }
   0xb   :  { %182 = vmatprep.subr.mxu0 %v226_v1  ;;  %v155_v29 = vld [vmem:[%s308_s3] ss:$0 sm:$0xff]  ;;  %p211_p3 = por %p210_p2, %p209_p1 }
   0xc   :  { %183 = vmatpush3.msra.mxu0 %v25_v6  ;;  %v124_v19 = vadd.s32 %v123_v18, %v119_v17 }
   0xd   :  { %184 = vmatprep.subr.mxu0 %v226_v1  ;;  %p212_p4 = pnand %p211_p3, %p205_p0 }
   0xe   :  { %185 = vmatpush3.msra.mxu0 %v24_v7  ;;  %v127_v21 = vxor.u32 %v126_v20, %v124_v19 }
   0xf   :  { %186 = vmatprep.subr.mxu0 %v226_v1 }
  0x10   :  { %187 = vmatpush3.msra.mxu0 %v23_v8  ;;  %v128_v22 = vshrl.u32 %v127_v21, 16 }
  0x11   :  { %188 = vmatprep.subr.mxu0 %v226_v1 }
  0x12   :  { %189 = vmatpush3.msra.mxu0 %v22_v9  ;;  %v129_v23 = vxor.u32 %v128_v22, %v127_v21 }
  0x13   :  { %190 = vmatprep.subr.mxu0 %v226_v1 }
  0x14   :  { %191 = vmatpush3.msra.mxu0 %v21_v10  ;;  %v130_v24 = vmul.u32 2246822507, %v129_v23 }
  0x15   :  { %192 = vmatprep.subr.mxu0 %v226_v1 }
  0x16   :  { %193 = vmatpush3.msra.mxu0 %v20_v11  ;;  %v131_v25 = vshrl.u32 %v130_v24, 13 }
  0x17   :  { %194 = vmatprep.subr.mxu0 %v226_v1 }
  0x18   :  { %195 = vmatpush3.msra.mxu0 %v19_v12  ;;  %v132_v26 = vxor.u32 %v131_v25, %v130_v24 }
  0x19   :  { %196 = vmatprep.subr.mxu0 %v226_v1 }
  0x1a   :  { %197 = vmatpush3.msra.mxu0 %v18_v13  ;;  %v133_v27 = vmul.u32 3266489909, %v132_v26 }
  0x1b   :  { %199 = vmatmul.mubr.msk.f32.vlgmr.msra.gmra.mxu0 %vm38_vm2, %v17_v14 }
  0x1c   :  { %v134_v28 = vshrl.u32 %v133_v27, 16 }
  0x1e   :  { %v135_v30 = vxor.u32 %v134_v28, %v133_v27 }
  0x20   :  { %vm136_vm3 = vcmp.lt.u32.totalorder %v135_v30, 2147483648 }
  0xdb   :  { %v112_v31 = vpop.f32.mrf.mxu0 }
  0xdc   :  { %v113_v32 = vadd.f32 %v155_v29, %v112_v31 }
  0xdd   :  { %v200_v33 = vpop.f32.mrf.mxu0 }
  0xde   :  { %v137_v34 = vmul.f32 2.0, %v113_v32 }
  0xe0   :  { %v138_v35 = vsel %vm136_vm3, %v137_v34, 0.0 }
  0xe1   :  { %140 = vst.msk [vmem:[#allocation4] sm:$0xff] %vm139_vm4, %v138_v35 }
  0xe2   :  { %215 = shalt.err (!%p212_p4)
}
  0xe3   :  { %150 = dma.vmem_to_hbm [thread:$0]  %s148_s20, 128, %s309_s4, [#allocation5]  }
  0xe4   :  { %224 = dma.done.wait [#allocation5], 128  }
  0xe5   :  { %225 = vsyncadd [#allocation5], 4294967168 }
  0xe6   :  { %154 = vsyncpa [#allocation5], 1 }

</bundles_post_ra>
